<compile_context>
chip_gen: v5e
topology: v5e:2x2
jax: 0.10.0
libtpu: 0.0.40
codegen_flags: <defaults>
</compile_context>

<pallas_src>
import functools

import jax
import jax.numpy as jnp
from jax.experimental import pallas as pl
from jax.experimental.pallas import tpu as pltpu


def _round_up(x, m):
    return ((x + m - 1) // m) * m


def _vmem_capacity_bytes():
    """Physical per-core VMEM; falls back to the smallest (v7x, 64 MiB)."""
    try:
        info = pltpu.get_tpu_info()
        cap = getattr(info, "vmem_capacity_bytes", None)
        if cap:
            return int(cap)
    except Exception:
        pass
    return 64 << 20


def _sublane_rows(itemsize):
    # Sub-32-bit dtypes pack rows along sublanes: 8 for f32, 16 bf16, 32 int8.
    return max(8, 32 // int(itemsize))


def _choose_tiles(batch, feat, itemsize):
    """Pick (tile_rows, tile_cols) for a ~2 MiB-per-input-tile streaming kernel."""
    sub = _sublane_rows(itemsize)
    target_tile_bytes = 2 << 20  # ~2 MiB per input tile: already at HBM roofline

    # Column chunk: full D if even a minimal (sub-row) tile fits the target,
    # otherwise a 128-aligned chunk (D-chunking bounds VMEM independent of D).
    if feat * itemsize * sub <= target_tile_bytes:
        td = feat
    else:
        td = (target_tile_bytes // (sub * itemsize) // 128) * 128
        td = max(128, min(int(td), _round_up(feat, 128)))

    # Row tile: fill the byte target with the chosen column chunk.
    tb = target_tile_bytes // max(td * itemsize, 1)
    tb = (tb // sub) * sub
    # Keep >= ~8 row tiles so pipelining has work and v7x's 2 TCs both get tiles.
    tb = min(tb, _round_up(pl.cdiv(batch, 8), sub))
    tb = min(tb, _round_up(batch, sub))
    tb = max(tb, sub)
    return int(tb), int(td)


def _triplet_kernel(a_ref, p_ref, n_ref, out_ref, acc_p, acc_n, *,
                    margin, batch, feat, tile_rows, tile_cols,
                    ragged_rows, ragged_cols):
    i = pl.program_id(0)          # row-tile index ("parallel")
    k = pl.program_id(1)          # column-chunk index ("arbitrary")
    nk = pl.num_programs(1)

    @pl.when(k == 0)
    def _():
        acc_p[...] = jnp.zeros_like(acc_p)
        acc_n[...] = jnp.zeros_like(acc_n)

    # Upcast BEFORE subtracting: data is already in VMEM so this is free
    # bandwidth-wise, and it avoids rounding the difference in bf16/fp16.
    a = a_ref[...].astype(jnp.float32)
    p = p_ref[...].astype(jnp.float32)
    n = n_ref[...].astype(jnp.float32)

    dp = a - p
    dn = a - n
    sq_p = dp * dp
    sq_n = dn * dn

    if ragged_cols:
        # Mask columns of the ragged last D-chunk (select, NOT multiply —
        # padded columns hold undefined data).
        col = k * tile_cols + jax.lax.broadcasted_iota(jnp.int32, sq_p.shape, 1)
        valid = col < feat
        sq_p = jnp.where(valid, sq_p, 0.0)
        sq_n = jnp.where(valid, sq_n, 0.0)

    acc_p[...] += jnp.sum(sq_p, axis=1, keepdims=True)   # (TB, 1)
    acc_n[...] += jnp.sum(sq_n, axis=1, keepdims=True)   # (TB, 1)

    @pl.when(k == nk - 1)
    def _():
        hinge = jnp.maximum(acc_p[...] - acc_n[...] + margin, 0.0)   # (TB, 1)
        if ragged_rows:
            # Mask padded rows of the ragged last row tile (select, NOT
            # multiply — padded rows may carry NaN/Inf garbage distances).
            row = i * tile_rows + jax.lax.broadcasted_iota(
                jnp.int32, hinge.shape, 0)
            hinge = jnp.where(row < batch, hinge, 0.0)
        # Lane-dense (1, 8, 128) partial-sum store; wrapper reads [:, 0, 0].
        out_ref[...] = jnp.full(out_ref.shape, jnp.sum(hinge),
                                dtype=jnp.float32)


def _reference(anchor, positive, negative, margin, size_average=True):
    a = anchor.astype(jnp.float32)
    p = positive.astype(jnp.float32)
    n = negative.astype(jnp.float32)
    dp = jnp.sum((a - p) ** 2, axis=1)
    dn = jnp.sum((a - n) ** 2, axis=1)
    losses = jnp.maximum(dp - dn + margin, 0.0)
    return jnp.mean(losses) if size_average else jnp.sum(losses)


def triplet_loss(anchor, positive, negative, margin, size_average=True,
                 tile_rows=None, tile_cols=None, min_kernel_elements=65536):
    """Pallas TPU implementation of TripletLoss.forward."""
    assert anchor.shape == positive.shape == negative.shape
    assert anchor.ndim == 2
    B, D = anchor.shape
    itemsize = jnp.dtype(anchor.dtype).itemsize

    # Tiny problems: a kernel launch + grid overhead dominates; let XLA fuse.
    if B * D < min_kernel_elements:
        return _reference(anchor, positive, negative, margin, size_average)

    auto_tb, auto_td = _choose_tiles(B, D, itemsize)
    tb = int(tile_rows) if tile_rows is not None else auto_tb
    td = int(tile_cols) if tile_cols is not None else auto_td

    num_row_tiles = pl.cdiv(B, tb)
    num_col_tiles = pl.cdiv(D, td)
    ragged_rows = (B % tb) != 0
    ragged_cols = (D % td) != 0

    # Need-based VMEM limit (+ ~25% headroom + a small floor for Mosaic
    # internal scratch), clamped to physical VMEM (64 MiB/TC on v7x).
    tile_bytes_in = tb * td * itemsize
    tmp_bytes_f32 = 3 * tb * td * 4                    # dp/dn/squares temporaries
    vmem_need = (3 * 2 * tile_bytes_in + tmp_bytes_f32
                 + 2 * (8 * 128 * 4)                   # output double buffers
                 + 2 * (tb * 4))                       # scratch accumulators
    vmem_limit = int(vmem_need * 1.25) + (4 << 20)
    vmem_limit = min(vmem_limit, _vmem_capacity_bytes())

    kernel = functools.partial(
        _triplet_kernel,
        margin=float(margin), batch=B, feat=D,
        tile_rows=tb, tile_cols=td,
        ragged_rows=ragged_rows, ragged_cols=ragged_cols)

    grid_spec = pltpu.PrefetchScalarGridSpec(
        num_scalar_prefetch=0,
        grid=(num_row_tiles, num_col_tiles),
        in_specs=[
            pl.BlockSpec((tb, td), lambda i, k: (i, k)),
            pl.BlockSpec((tb, td), lambda i, k: (i, k)),
            pl.BlockSpec((tb, td), lambda i, k: (i, k)),
        ],
        out_specs=pl.BlockSpec((1, 8, 128), lambda i, k: (i, 0, 0)),
        scratch_shapes=[
            pltpu.VMEM((tb, 1), jnp.float32),
            pltpu.VMEM((tb, 1), jnp.float32),
        ],
    )

    cost = pl.CostEstimate(
        flops=6 * B * D,
        transcendentals=0,
        bytes_accessed=3 * B * D * itemsize + num_row_tiles * 8 * 128 * 4,
    )

    partials = pl.pallas_call(
        kernel,
        out_shape=jax.ShapeDtypeStruct((num_row_tiles, 8, 128), jnp.float32),
        grid_spec=grid_spec,
        compiler_params=pltpu.CompilerParams(
            dimension_semantics=("parallel", "arbitrary"),
            vmem_limit_bytes=int(vmem_limit),
        ),
        cost_estimate=cost,
    )(anchor, positive, negative)

    total = jnp.sum(partials[:, 0, 0])
    if size_average:
        total = total * (1.0 / B)   # single final scale (not per-tile mean)
    return total


if __name__ == "__main__":
    key = jax.random.PRNGKey(0)
    k1, k2, k3, k4, k5, k6, k7, k8, k9 = jax.random.split(key, 9)
    margin = 1.0

    # Small embedding batch, matching the module's (B, D) semantics.
    # min_kernel_elements=0 forces the Pallas path (the default would
    # short-circuit this tiny shape to plain XLA).
    B, D = 8, 32
    anchor = jax.random.normal(k1, (B, D), dtype=jnp.float32)
    positive = jax.random.normal(k2, (B, D), dtype=jnp.float32)
    negative = jax.random.normal(k3, (B, D), dtype=jnp.float32)

    out_mean = triplet_loss(anchor, positive, negative, margin,
                            size_average=True, min_kernel_elements=0)
    jax.block_until_ready(out_mean)
    ref_mean = _reference(anchor, positive, negative, margin, size_average=True)

    out_sum = triplet_loss(anchor, positive, negative, margin,
                           size_average=False, min_kernel_elements=0)
    jax.block_until_ready(out_sum)
    ref_sum = _reference(anchor, positive, negative, margin, size_average=False)

    assert jnp.allclose(out_mean, ref_mean, rtol=1e-5, atol=1e-5), (out_mean, ref_mean)
    assert jnp.allclose(out_sum, ref_sum, rtol=1e-5, atol=1e-5), (out_sum, ref_sum)

    # Multi-row-tile + ragged batch: exercises the pipelined row grid,
    # per-tile partial sums and the padded-row mask.
    B2, D2 = 37, 128
    a2 = jax.random.normal(k4, (B2, D2), dtype=jnp.float32)
    p2 = jax.random.normal(k5, (B2, D2), dtype=jnp.float32)
    n2 = jax.random.normal(k6, (B2, D2), dtype=jnp.float32)
    out2 = triplet_loss(a2, p2, n2, margin, size_average=True,
                        tile_rows=16, min_kernel_elements=0)
    jax.block_until_ready(out2)
    ref2 = _reference(a2, p2, n2, margin, size_average=True)
    assert jnp.allclose(out2, ref2, rtol=1e-4, atol=1e-4), (out2, ref2)

    # D-chunking path (ragged column chunks + scratch accumulators across the
    # "arbitrary" grid axis).
    B3, D3 = 24, 300
    a3 = jax.random.normal(k7, (B3, D3), dtype=jnp.float32)
    p3 = jax.random.normal(k8, (B3, D3), dtype=jnp.float32)
    n3 = jax.random.normal(k9, (B3, D3), dtype=jnp.float32)
    out3 = triplet_loss(a3, p3, n3, margin, size_average=True,
                        tile_rows=8, tile_cols=128, min_kernel_elements=0)
    jax.block_until_ready(out3)
    ref3 = _reference(a3, p3, n3, margin, size_average=True)
    assert jnp.allclose(out3, ref3, rtol=1e-4, atol=1e-4), (out3, ref3)

    print("KERNEL_OK")
</pallas_src>

<mosaic_0001>
module attributes {stable_mosaic.version = 11 : i64} {
  func.func @_triplet_kernel(%arg0: i32, %arg1: i32, %arg2: memref<8x32xf32, #tpu.memory_space<vmem>>, %arg3: memref<8x32xf32, #tpu.memory_space<vmem>>, %arg4: memref<8x32xf32, #tpu.memory_space<vmem>>, %arg5: memref<1x8x128xf32, #tpu.memory_space<vmem>>, %arg6: memref<8x1xf32, #tpu.memory_space<vmem>>, %arg7: memref<8x1xf32, #tpu.memory_space<vmem>>) attributes {dimension_semantics = [#tpu.dimension_semantics<parallel>, #tpu.dimension_semantics<arbitrary>], iteration_bounds = array<i64: 1, 1>, scalar_prefetch = 0 : i64, scratch_operands = 2 : i64, tpu.core_type = #tpu.core_type<tc>, window_params = [{transform_indices = @transform_0, window_bounds = array<i64: 8, 32>}, {transform_indices = @transform_1, window_bounds = array<i64: 8, 32>}, {transform_indices = @transform_2, window_bounds = array<i64: 8, 32>}, {transform_indices = @transform_3, window_bounds = array<i64: 1, 8, 128>}]} {
    %c0_i32 = arith.constant 0 : i32
    %0 = arith.cmpi eq, %arg1, %c0_i32 : i32
    %1 = arith.extui %0 : i1 to i32
    %c0_i32_0 = arith.constant 0 : i32
    %2 = arith.cmpi ne, %1, %c0_i32_0 : i32
    scf.if %2 {
      %cst_17 = arith.constant 0.000000e+00 : f32
      %23 = vector.broadcast %cst_17 : f32 to vector<8x1xf32>
      %c0_18 = arith.constant 0 : index
      %c0_19 = arith.constant 0 : index
      %24 = vector.load %arg6[%c0_18, %c0_19] : memref<8x1xf32, #tpu.memory_space<vmem>>, vector<8x1xf32>
      tpu.vector_store %arg6[%c0_18, %c0_19], %23 {strides = array<i32>} : memref<8x1xf32, #tpu.memory_space<vmem>>, vector<8x1xf32>,
      %cst_20 = arith.constant 0.000000e+00 : f32
      %25 = vector.broadcast %cst_20 : f32 to vector<8x1xf32>
      %c0_21 = arith.constant 0 : index
      %c0_22 = arith.constant 0 : index
      %26 = vector.load %arg7[%c0_21, %c0_22] : memref<8x1xf32, #tpu.memory_space<vmem>>, vector<8x1xf32>
      tpu.vector_store %arg7[%c0_21, %c0_22], %25 {strides = array<i32>} : memref<8x1xf32, #tpu.memory_space<vmem>>, vector<8x1xf32>,
    } else {
    }
    %c0 = arith.constant 0 : index
    %c0_1 = arith.constant 0 : index
    %3 = vector.load %arg2[%c0, %c0_1] : memref<8x32xf32, #tpu.memory_space<vmem>>, vector<8x32xf32>
    %c0_2 = arith.constant 0 : index
    %c0_3 = arith.constant 0 : index
    %4 = vector.load %arg3[%c0_2, %c0_3] : memref<8x32xf32, #tpu.memory_space<vmem>>, vector<8x32xf32>
    %c0_4 = arith.constant 0 : index
    %c0_5 = arith.constant 0 : index
    %5 = vector.load %arg4[%c0_4, %c0_5] : memref<8x32xf32, #tpu.memory_space<vmem>>, vector<8x32xf32>
    %6 = arith.subf %3, %4 : vector<8x32xf32>
    %7 = arith.subf %3, %5 : vector<8x32xf32>
    %8 = arith.mulf %6, %6 : vector<8x32xf32>
    %9 = arith.mulf %7, %7 : vector<8x32xf32>
    %c0_6 = arith.constant 0 : index
    %c0_7 = arith.constant 0 : index
    %10 = vector.load %arg6[%c0_6, %c0_7] : memref<8x1xf32, #tpu.memory_space<vmem>>, vector<8x1xf32>
    %cst = arith.constant dense<0.000000e+00> : vector<8xf32>
    %11 = vector.multi_reduction <add>, %8, %cst [1] : vector<8x32xf32> to vector<8xf32>
    %12 = vector.shape_cast %11 : vector<8xf32> to vector<8x1xf32>
    %13 = arith.addf %10, %12 : vector<8x1xf32>
    %c0_8 = arith.constant 0 : index
    %c0_9 = arith.constant 0 : index
    %14 = vector.load %arg6[%c0_8, %c0_9] : memref<8x1xf32, #tpu.memory_space<vmem>>, vector<8x1xf32>
    tpu.vector_store %arg6[%c0_8, %c0_9], %13 {strides = array<i32>} : memref<8x1xf32, #tpu.memory_space<vmem>>, vector<8x1xf32>,
    %c0_10 = arith.constant 0 : index
    %c0_11 = arith.constant 0 : index
    %15 = vector.load %arg7[%c0_10, %c0_11] : memref<8x1xf32, #tpu.memory_space<vmem>>, vector<8x1xf32>
    %cst_12 = arith.constant dense<0.000000e+00> : vector<8xf32>
    %16 = vector.multi_reduction <add>, %9, %cst_12 [1] : vector<8x32xf32> to vector<8xf32>
    %17 = vector.shape_cast %16 : vector<8xf32> to vector<8x1xf32>
    %18 = arith.addf %15, %17 : vector<8x1xf32>
    %c0_13 = arith.constant 0 : index
    %c0_14 = arith.constant 0 : index
    %19 = vector.load %arg7[%c0_13, %c0_14] : memref<8x1xf32, #tpu.memory_space<vmem>>, vector<8x1xf32>
    tpu.vector_store %arg7[%c0_13, %c0_14], %18 {strides = array<i32>} : memref<8x1xf32, #tpu.memory_space<vmem>>, vector<8x1xf32>,
    %c0_i32_15 = arith.constant 0 : i32
    %20 = arith.cmpi eq, %arg1, %c0_i32_15 : i32
    %21 = arith.extui %20 : i1 to i32
    %c0_i32_16 = arith.constant 0 : i32
    %22 = arith.cmpi ne, %21, %c0_i32_16 : i32
    scf.if %22 {
      %c0_17 = arith.constant 0 : index
      %c0_18 = arith.constant 0 : index
      %23 = vector.load %arg6[%c0_17, %c0_18] : memref<8x1xf32, #tpu.memory_space<vmem>>, vector<8x1xf32>
      %c0_19 = arith.constant 0 : index
      %c0_20 = arith.constant 0 : index
      %24 = vector.load %arg7[%c0_19, %c0_20] : memref<8x1xf32, #tpu.memory_space<vmem>>, vector<8x1xf32>
      %25 = arith.subf %23, %24 : vector<8x1xf32>
      %cst_21 = arith.constant 1.000000e+00 : f32
      %26 = vector.broadcast %cst_21 : f32 to vector<8x1xf32>
      %27 = arith.addf %25, %26 : vector<8x1xf32>
      %cst_22 = arith.constant 0.000000e+00 : f32
      %28 = vector.broadcast %cst_22 : f32 to vector<8x1xf32>
      %29 = arith.maximumf %27, %28 : vector<8x1xf32>
      %30 = vector.shape_cast %29 : vector<8x1xf32> to vector<1x8x1xf32>
      %cst_23 = arith.constant dense<0.000000e+00> : vector<1xf32>
      %31 = vector.multi_reduction <add>, %30, %cst_23 [1, 2] : vector<1x8x1xf32> to vector<1xf32>
      %32 = vector.shape_cast %31 : vector<1xf32> to vector<1x1x1xf32>
      %33 = vector.extract %32[0, 0, 0] : f32 from vector<1x1x1xf32>
      %34 = vector.broadcast %33 : f32 to vector<1x8x128xf32>
      %c0_24 = arith.constant 0 : index
      %c0_25 = arith.constant 0 : index
      %c0_26 = arith.constant 0 : index
      %35 = vector.load %arg5[%c0_24, %c0_25, %c0_26] : memref<1x8x128xf32, #tpu.memory_space<vmem>>, vector<1x8x128xf32>
      tpu.vector_store %arg5[%c0_24, %c0_25, %c0_26], %34 {strides = array<i32>} : memref<1x8x128xf32, #tpu.memory_space<vmem>>, vector<1x8x128xf32>,
    } else {
    }
    return
  }
  func.func @transform_0(%arg0: i32, %arg1: i32) -> (i32, i32) {
    %c0_i32 = arith.constant 0 : i32
    return %arg0, %arg1 : i32, i32
  }
  func.func @transform_1(%arg0: i32, %arg1: i32) -> (i32, i32) {
    %c0_i32 = arith.constant 0 : i32
    return %arg0, %arg1 : i32, i32
  }
  func.func @transform_2(%arg0: i32, %arg1: i32) -> (i32, i32) {
    %c0_i32 = arith.constant 0 : i32
    return %arg0, %arg1 : i32, i32
  }
  func.func @transform_3(%arg0: i32, %arg1: i32) -> (i32, i32, i32) {
    %c0_i32 = arith.constant 0 : i32
    %c0_i32_0 = arith.constant 0 : i32
    %c0_i32_1 = arith.constant 0 : i32
    return %arg0, %c0_i32, %c0_i32_0 : i32, i32, i32
  }
}

</mosaic_0001>

<bundles_post_ra>
// kernel: tpu_custom_call.1
= control target key start
LH: loop header
LB: loop body
LE: loop exit
PB: predicated region body
PF: predicated region fallthrough
CT: control target
= control target key end

     0   :  { %8 = vsyncpa [#allocation5], 0  ;;  %s273_s0 = inlined_call_operand.hbm [shape: f32[8,32], index: 0, kind: input, shape index: {}]   ;;  %s274_s1 = inlined_call_operand.hbm [shape: f32[8,32], index: 1, kind: input, shape index: {}]   ;;  %s275_s2 = inlined_call_operand.hbm [shape: f32[8,32], index: 2, kind: input, shape index: {}]   ;;  %s276_s3 = inlined_call_operand.hbm [shape: f32[1,8,128], index: 3, kind: output, shape index: {}]  }
   0x1   :  { %9 = vsyncpa [#allocation8], 0  ;;  %s27_s14 = sshll.u32 %s274_s1, 4  ;;  %s28_s14 = int_to_ptr.hbm [resolvable:$true] %s27_s14 }
   0x2   :  { %10 = vsyncpa [#allocation6], 0  ;;  %s231_s15 = smov [#allocation7]   ;;  %s16_s19 = sshll.u32 %s273_s0, 4  ;;  %s17_s19 = int_to_ptr.hbm [resolvable:$true] %s16_s19 }
   0x3   :  { %s29_s16 = sshll.u32 %s231_s15, 4  ;;  %s232_s20 = smov [#allocation4]   ;;  %s30_s16 = int_to_ptr.vmem [resolvable:$true] %s29_s16 }
   0x4   :  { %32 = dma.hbm_to_vmem [thread:$0]  %s28_s14, 128, %s30_s16, [#allocation8]  }
   0x5   :  { %s18_s21 = sshll.u32 %s232_s20, 4  ;;  %s38_s24 = sshll.u32 %s275_s2, 4  ;;  %s19_s21 = int_to_ptr.vmem [resolvable:$true] %s18_s21  ;;  %s39_s24 = int_to_ptr.hbm [resolvable:$true] %s38_s24 }
   0x6   :  { %21 = dma.hbm_to_vmem [thread:$0]  %s17_s19, 128, %s19_s21, [#allocation5]  }
   0x7   :  { %s233_s1 = smov [#allocation9]  }
   0x8   :  { %s40_s25 = sshll.u32 %s233_s1, 4  ;;  %s41_s25 = int_to_ptr.vmem [resolvable:$true] %s40_s25 }
   0x9   :  { %43 = dma.hbm_to_vmem [thread:$0]  %s39_s24, 128, %s41_s25, [#allocation8]  }
   0xa   :  { %225 = dma.done.wait [#allocation5], 128  }
   0xb   :  { %226 = vsyncadd [#allocation5], 4294967168 }
   0xc   :  { %227 = dma.done.wait [#allocation8], 256  }
   0xd   :  { %228 = vsyncadd [#allocation8], 4294967040  ;;  %vm60_vm0 = vcmask 7168   ;;  %v234_v0 = vmov 0.0   ;;  %v63_v1 = vld [vmem:[#allocation4] sm:$0xff]  ;;  %v64_v2 = vld [vmem:[#allocation7] sm:$0xff] }
   0xe   :  { %61 = vst.msk [vmem:[#allocation2] sm:$0xff] %vm60_vm0, %v234_v0  ;;  %v65_v3 = vld [vmem:[#allocation9] sm:$0xff]  ;;  %v66_v4 = vsub.f32 %v63_v1, %v64_v2  ;;  %vm71_vm1 = vcmask 261120   ;;  %s235_s0 = smov [#allocation10]   ;;  %s111_s28 = sshll.u32 %s276_s3, 4  ;;  %s112_s28 = int_to_ptr.hbm [resolvable:$true] %s111_s28 }
   0xf   :  { %62 = vst.msk [vmem:[#allocation3] sm:$0xff] %vm60_vm0, %v234_v0  ;;  %v67_v6 = vsub.f32 %v63_v1, %v65_v3  ;;  %s109_s2 = sshll.u32 %s235_s0, 4  ;;  %s110_s2 = int_to_ptr.vmem [resolvable:$true] %s109_s2 }
  0x10   :  { %v68_v5 = vmul.f32 %v66_v4, %v66_v4 }
  0x11   :  { %v69_v8 = vmul.f32 %v67_v6, %v67_v6 }
  0x12   :  { %v72_v7 = vsel %vm71_vm1, %v68_v5, 0.0 }
  0x13   :  { %73 = vadd.xlane.f32.xlu0 %v72_v7  ;;  %v79_v9 = vsel %vm71_vm1, %v69_v8, 0.0 }
  0x15   :  { %v70_v10 = vld [vmem:[#allocation2] sm:$0xff] }
  0x16   :  { %v78_v13 = vld [vmem:[#allocation3] sm:$0xff] }
  0x1b   :  { %80 = vadd.xlane.f32.xlu0 %v79_v9 }
  0x86   :  { %v74_v11 = vpop.xlane.xlu0 %73 }
  0x87   :  { %v75_v12 = vadd.f32 %v74_v11, %v70_v10 }
  0x89   :  { %77 = vst.msk [vmem:[#allocation2] sm:$0xff] %vm60_vm0, %v75_v12 }
  0x8e   :  { %v81_v14 = vpop.xlane.xlu0 %80 }
  0x8f   :  { %v82_v15 = vadd.f32 %v81_v14, %v78_v13 }
  0x90   :  { %v87_v16 = vld [vmem:[#allocation2] sm:$0xff] }
  0x91   :  { %83 = vst.msk [vmem:[#allocation3] sm:$0xff] %vm60_vm0, %v82_v15 }
  0x98   :  { %v88_v17 = vld [vmem:[#allocation3] sm:$0xff] }
  0x99   :  { %v89_v18 = vsub.f32 %v87_v16, %v88_v17 }
  0x9b   :  { %v90_v19 = vadd.f32 1.0, %v89_v18 }
  0x9d   :  { %v91_v20 = vmax.f32 %v90_v19, 0.0 }
  0x9f   :  { %v92_v21 = vsel %vm60_vm0, %v91_v20, 0.0 }
  0xa0   :  { %93 = vadd.xlane.f32.xlu1 %v92_v21 }
 0x113   :  { %v94_v22 = vpop.xlane.xlu1 %93 }
 0x114   :  { %v95_v23 = vrot.slane %v94_v22, 4 }
 0x116   :  { %v96_v24 = vadd.f32 %v95_v23, %v94_v22 }
 0x118   :  { %v97_v25 = vrot.slane %v96_v24, 2 }
 0x11a   :  { %v98_v26 = vadd.f32 %v97_v25, %v96_v24 }
 0x11c   :  { %v99_v27 = vrot.slane %v98_v26, 1 }
 0x11e   :  { %v100_v28 = vadd.f32 %v99_v27, %v98_v26 }
 0x120   :  { %122 = vpush %v100_v28 }
 0x151   :  { %s123_s29 = spop %122 }
 0x152   :  { %v102_v29 = vstv %s123_s29 }
 0x153   :  { %103 = vst [vmem:[#allocation10] sm:$0xff] %v102_v29 }
 0x154   :  { %114 = dma.vmem_to_hbm [thread:$0]  %s110_s2, 128, %s112_s28, [#allocation6]  }
 0x155   :  { %229 = dma.done.wait [#allocation6], 128  }
 0x156   :  { %230 = vsyncadd [#allocation6], 4294967168 }
 0x157   :  { %119 = vsyncpa [#allocation5], 1 }
 0x158   :  { %120 = vsyncpa [#allocation8], 1 }
 0x159   :  { %121 = vsyncpa [#allocation6], 1 }

</bundles_post_ra>
